<compile_context>
chip_gen: v6e
topology: v6e:2x2x1
jax: 0.10.0
libtpu: 0.0.40
codegen_flags: <defaults>
</compile_context>

<pallas_src>
import jax
import jax.numpy as jnp
from jax.experimental import pallas as pl
from jax.experimental.pallas import tpu as pltpu


def _pe2d_kernel(x_ref, coord_ref, o_ref):
    # x_ref / o_ref : (block_rows, tile_F); coord_ref : (1, tile_F) — sublane-broadcast add.
    o_ref[...] = x_ref[...] + coord_ref[...]


def _sublane_multiple(itemsize: int) -> int:
    # f32 -> 8, bf16/f16 -> 16, int8/fp8 -> 32 (sub-32-bit dtypes pack along sublanes).
    return {4: 8, 2: 16, 1: 32}.get(itemsize, 8)


def _vmem_capacity_bytes() -> int:
    try:
        return int(pltpu.get_tpu_info().vmem_capacity_bytes)
    except Exception:
        return 64 << 20  # conservative fallback (v7x per-TC VMEM)


def _choose_tiles(rows: int, F: int, itemsize: int, sublane: int, target_bytes: int):
    """Pick (block_rows, tile_F).

    Prefer keeping F whole (full last dim => always layout-legal, single F block).
    Only tile F (in 128-lane multiples) when even a sublane-height block of full F
    would exceed the per-tile budget.
    """
    row_bytes = F * itemsize
    if sublane * row_bytes <= target_bytes:
        tile_F = F
        block_rows = max(sublane, (target_bytes // max(row_bytes, 1)) // sublane * sublane)
        block_rows = min(block_rows, pl.cdiv(rows, sublane) * sublane)
        # Megacore balance: prefer an even number of row steps when there is >1 step.
        steps = pl.cdiv(rows, block_rows)
        if steps > 1 and steps % 2 == 1:
            cand = max(sublane, pl.cdiv(pl.cdiv(rows, steps + 1), sublane) * sublane)
            if pl.cdiv(rows, cand) % 2 == 0:
                block_rows = cand
    else:
        # Huge F: keep rows at sublane height and tile the lane axis in 128-multiples.
        block_rows = sublane
        tile_F = max(128, (target_bytes // (sublane * itemsize)) // 128 * 128)
        tile_F = min(tile_F, pl.cdiv(F, 128) * 128)
    return block_rows, tile_F


def positional_encoding_2d(token_embedding: jax.Array, dropout: float = 0.0) -> jax.Array:
    """token_embedding: (bs, seq_len, x_grid, y_grid, dim) with dim == 2."""
    del dropout  # p=0.0 / eval mode -> identity
    bs, seq_len, x_grid, y_grid, dim = token_embedding.shape
    assert dim == 2, "PyTorch broadcasting in this module requires dim == 2"

    dtype = token_embedding.dtype
    itemsize = jnp.dtype(dtype).itemsize
    rows = bs * seq_len
    F = x_grid * y_grid * dim
    x2d = token_embedding.reshape(rows, F)

    # Precompute the (1, F) coordinate row once (handles x_grid==1 / y_grid==1 like torch.linspace).
    xs = jnp.linspace(-1.0, 1.0, x_grid, dtype=jnp.float32)
    ys = jnp.linspace(-1.0, 1.0, y_grid, dtype=jnp.float32)
    xx, yy = jnp.meshgrid(xs, ys, indexing="ij")
    coord_row = jnp.stack([xx, yy], axis=-1).reshape(1, F).astype(dtype)  # matches torch `.to(...)`

    # Generation-aware tile budget (128 MiB VMEM on v5e/v6e, 64 MiB on v7x).
    sublane = _sublane_multiple(itemsize)
    if _vmem_capacity_bytes() >= (100 << 20):
        target_bytes, vmem_limit = 14 << 20, 96 << 20   # v5e / v6e
    else:
        target_bytes, vmem_limit = 10 << 20, 48 << 20   # v7x

    block_rows, tile_F = _choose_tiles(rows, F, itemsize, sublane, target_bytes)
    grid = (pl.cdiv(rows, block_rows), pl.cdiv(F, tile_F))

    cost = pl.CostEstimate(
        flops=rows * F,
        transcendentals=0,
        bytes_accessed=2 * rows * F * itemsize + F * itemsize,
    )

    out2d = pl.pallas_call(
        _pe2d_kernel,
        out_shape=jax.ShapeDtypeStruct((rows, F), dtype),
        grid_spec=pltpu.PrefetchScalarGridSpec(
            num_scalar_prefetch=0,
            grid=grid,
            in_specs=[
                pl.BlockSpec((block_rows, tile_F), lambda i, j: (i, j)),
                pl.BlockSpec((1, tile_F), lambda i, j: (0, j)),
            ],
            out_specs=pl.BlockSpec((block_rows, tile_F), lambda i, j: (i, j)),
        ),
        compiler_params=pltpu.CompilerParams(
            dimension_semantics=("parallel", "parallel"),
            vmem_limit_bytes=vmem_limit,
        ),
        cost_estimate=cost,
    )(x2d, coord_row)

    return out2d.reshape(bs, seq_len, x_grid, y_grid, dim)


def _reference(token_embedding: jax.Array) -> jax.Array:
    bs, seq_len, x_grid, y_grid, dim = token_embedding.shape
    xs = jnp.linspace(-1.0, 1.0, x_grid)
    ys = jnp.linspace(-1.0, 1.0, y_grid)
    xx, yy = jnp.meshgrid(xs, ys, indexing="ij")
    coord = jnp.concatenate([xx[..., None], yy[..., None]], axis=-1)  # (x_grid, y_grid, 2)
    coord = coord[None, None].astype(token_embedding.dtype)
    return token_embedding + coord


if __name__ == "__main__":
    key = jax.random.PRNGKey(0)
    bs, seq_len, x_grid, y_grid, dim = 2, 8, 16, 16, 2
    x = jax.random.normal(key, (bs, seq_len, x_grid, y_grid, dim), dtype=jnp.float32)

    out = positional_encoding_2d(x, dropout=0.0)
    out = jax.block_until_ready(out)

    ref = _reference(x)
    assert out.shape == ref.shape and out.dtype == ref.dtype
    assert jnp.allclose(out, ref, atol=1e-6, rtol=1e-6), "mismatch vs reference"
    print("KERNEL_OK")
</pallas_src>

<mosaic_0001>
module attributes {stable_mosaic.version = 11 : i64} {
  func.func @_pe2d_kernel(%arg0: i32, %arg1: i32, %arg2: memref<16x512xf32, #tpu.memory_space<vmem>>, %arg3: memref<1x512xf32, #tpu.memory_space<vmem>>, %arg4: memref<16x512xf32, #tpu.memory_space<vmem>>) attributes {dimension_semantics = [#tpu.dimension_semantics<parallel>, #tpu.dimension_semantics<parallel>], iteration_bounds = array<i64: 1, 1>, scalar_prefetch = 0 : i64, scratch_operands = 0 : i64, tpu.core_type = #tpu.core_type<tc>, window_params = [{transform_indices = @transform_0, window_bounds = array<i64: 16, 512>}, {transform_indices = @transform_1, window_bounds = array<i64: 1, 512>}, {transform_indices = @transform_2, window_bounds = array<i64: 16, 512>}]} {
    %c0 = arith.constant 0 : index
    %c0_0 = arith.constant 0 : index
    %0 = vector.load %arg2[%c0, %c0_0] : memref<16x512xf32, #tpu.memory_space<vmem>>, vector<16x512xf32>
    %c0_1 = arith.constant 0 : index
    %c0_2 = arith.constant 0 : index
    %1 = vector.load %arg3[%c0_1, %c0_2] : memref<1x512xf32, #tpu.memory_space<vmem>>, vector<1x512xf32>
    %2 = vector.broadcast %1 : vector<1x512xf32> to vector<16x512xf32>
    %3 = arith.addf %0, %2 : vector<16x512xf32>
    %c0_3 = arith.constant 0 : index
    %c0_4 = arith.constant 0 : index
    %4 = vector.load %arg4[%c0_3, %c0_4] : memref<16x512xf32, #tpu.memory_space<vmem>>, vector<16x512xf32>
    tpu.vector_store %arg4[%c0_3, %c0_4], %3 {strides = array<i32>} : memref<16x512xf32, #tpu.memory_space<vmem>>, vector<16x512xf32>,
    return
  }
  func.func @transform_0(%arg0: i32, %arg1: i32) -> (i32, i32) {
    %c0_i32 = arith.constant 0 : i32
    return %arg0, %arg1 : i32, i32
  }
  func.func @transform_1(%arg0: i32, %arg1: i32) -> (i32, i32) {
    %c0_i32 = arith.constant 0 : i32
    %c0_i32_0 = arith.constant 0 : i32
    return %c0_i32, %arg1 : i32, i32
  }
  func.func @transform_2(%arg0: i32, %arg1: i32) -> (i32, i32) {
    %c0_i32 = arith.constant 0 : i32
    return %arg0, %arg1 : i32, i32
  }
}

</mosaic_0001>

<bundles_post_ra>
// kernel: tpu_custom_call.1
= control target key start
LH: loop header
LB: loop body
LE: loop exit
PB: predicated region body
PF: predicated region fallthrough
CT: control target
= control target key end

     0   :  { %7 = vsyncpa [#allocation3], 0  ;;  %s208_s0 = inlined_call_operand.hbm [shape: f32[16,512], index: 0, kind: input, shape index: {}]   ;;  %s209_s1 = inlined_call_operand.hbm [shape: f32[1,512], index: 1, kind: input, shape index: {}]   ;;  %s210_s2 = inlined_call_operand.hbm [shape: f32[16,512], index: 2, kind: output, shape index: {}]  }
   0x1   :  { %8 = vsyncpa [#allocation6], 0 }
   0x2   :  { %9 = vsyncpa [#allocation4], 0  ;;  %s173_s9 = smov [#allocation2]  }
   0x3   :  { %s15_s10 = sshll.u32 %s173_s9, 4  ;;  %s16_s10 = int_to_ptr.vmem [resolvable:$true] %s15_s10 }
   0x4   :  { %s115_s11 = scalar_lea.vmem %s16_s10, 1024  ;;  %p120_p1 = scmp.lt.s32.totalorder %s16_s10, %s16_s10 }
   0x5   :  { %p116_p0 = scmp.ne.s32.totalorder %s16_s10, %s115_s11  ;;  %p121_p2 = scmp.lt.s32.totalorder %s115_s11, %s115_s11 }
   0x7   :  { %p122_p3 = por %p121_p2, %p120_p1 }
   0x9   :  { %p123_p4 = pnand %p122_p3, %p116_p0 }
   0xb   :  { %126 = shalt.err (!%p123_p4)
}
   0xc   :  { %s174_s12 = smov 512   ;;  %s175_s13 = smov 32  }
   0xd   :  { %21 = dma.hbm_to_vmem [thread:$0]  %s208_s0, 1024, %s16_s10, [#allocation3], %s174_s12, %s174_s12, %s175_s13  }
   0xe   :  { %s176_s16 = smov [#allocation5]  }
   0xf   :  { %s28_s17 = sshll.u32 %s176_s16, 4  ;;  %s29_s17 = int_to_ptr.vmem [resolvable:$true] %s28_s17 }
  0x10   :  { %s135_s18 = scalar_lea.vmem %s29_s17, 64  ;;  %p140_p6 = scmp.lt.s32.totalorder %s29_s17, %s29_s17 }
  0x11   :  { %p136_p5 = scmp.ne.s32.totalorder %s29_s17, %s135_s18  ;;  %p141_p7 = scmp.lt.s32.totalorder %s135_s18, %s135_s18 }
  0x13   :  { %p142_p8 = por %p141_p7, %p140_p6 }
  0x15   :  { %p143_p9 = pnand %p142_p8, %p136_p5 }
  0x17   :  { %146 = shalt.err (!%p143_p9)
}
  0x18   :  { %31 = dma.hbm_to_vmem [thread:$0]  %s209_s1, 64, %s29_s17, [#allocation6]  }
  0x19   :  { %167 = dma.done.wait [#allocation3], 1024  }
  0x1a   :  { %168 = vsyncadd [#allocation3], 4294966272 }
  0x1b   :  { %169 = dma.done.wait [#allocation6], 64  }
  0x1c   :  { %170 = vsyncadd [#allocation6], 4294967232  ;;  %v48_v0 = vlaneseq  ;;  %v38_v6 = vld [vmem:[#allocation2] sm:$0xff]  ;;  %v39_v8 = vld [vmem:[#allocation2 + $0x8] sm:$0xff]  ;;  %s177_s0 = smov [#allocation7]  }
  0x1d   :  { %v46_v7 = vld [vmem:[#allocation5] sm:$0xf]  ;;  %v40_v11 = vld [vmem:[#allocation2 + $0x10] sm:$0xff]  ;;  %v41_v13 = vld [vmem:[#allocation2 + $0x18] sm:$0xff]  ;;  %s89_s1 = sshll.u32 %s177_s0, 4  ;;  %s90_s1 = int_to_ptr.vmem [resolvable:$true] %s89_s1 }
  0x1e   :  { %v49_v1 = vshrl.u32 %v48_v0, 7  ;;  %v42_v15 = vld [vmem:[#allocation2 + $0x20] sm:$0xff]  ;;  %v43_v16 = vld [vmem:[#allocation2 + $0x28] sm:$0xff]  ;;  %v44_v17 = vld [vmem:[#allocation2 + $0x30] sm:$0xff]  ;;  %s147_s21 = scalar_lea.vmem %s90_s1, 1024  ;;  %p152_p11 = scmp.lt.s32.totalorder %s90_s1, %s90_s1 }
  0x1f   :  { %v45_v18 = vld [vmem:[#allocation2 + $0x38] sm:$0xff]  ;;  %p148_p10 = scmp.ne.s32.totalorder %s90_s1, %s147_s21  ;;  %p153_p12 = scmp.lt.s32.totalorder %s147_s21, %s147_s21 }
  0x20   :  { %v50_v2 = vsub.s32 0, %v49_v1  ;;  %v54_v3 = vsub.s32 1, %v49_v1  ;;  %v58_v4 = vsub.s32 2, %v49_v1  ;;  %v62_v5 = vsub.s32 3, %v49_v1 }
  0x21   :  { %p154_p13 = por %p153_p12, %p152_p11 }
  0x22   :  { %v51_v9 = vrot.slane %v46_v7, %v50_v2  ;;  %v55_v10 = vrot.slane %v46_v7, %v54_v3  ;;  %v59_v12 = vrot.slane %v46_v7, %v58_v4  ;;  %v63_v14 = vrot.slane %v46_v7, %v62_v5 }
  0x23   :  { %p155_p0 = pnand %p154_p13, %p148_p10 }
  0x24   :  { %v68_v19 = vadd.f32 %v51_v9, %v38_v6  ;;  %v69_v20 = vadd.f32 %v55_v10, %v39_v8  ;;  %v70_v21 = vadd.f32 %v59_v12, %v40_v11  ;;  %v71_v22 = vadd.f32 %v63_v14, %v41_v13 }
  0x25   :  { %v72_v23 = vadd.f32 %v51_v9, %v42_v15  ;;  %v73_v24 = vadd.f32 %v55_v10, %v43_v16  ;;  %v74_v25 = vadd.f32 %v59_v12, %v44_v17  ;;  %v75_v26 = vadd.f32 %v63_v14, %v45_v18 }
  0x26   :  { %76 = vst [vmem:[#allocation7] sm:$0xff] %v68_v19  ;;  %77 = vst [vmem:[#allocation7 + $0x8] sm:$0xff] %v69_v20 }
  0x27   :  { %78 = vst [vmem:[#allocation7 + $0x10] sm:$0xff] %v70_v21  ;;  %79 = vst [vmem:[#allocation7 + $0x18] sm:$0xff] %v71_v22 }
  0x28   :  { %80 = vst [vmem:[#allocation7 + $0x20] sm:$0xff] %v72_v23  ;;  %81 = vst [vmem:[#allocation7 + $0x28] sm:$0xff] %v73_v24 }
  0x29   :  { %82 = vst [vmem:[#allocation7 + $0x30] sm:$0xff] %v74_v25  ;;  %83 = vst [vmem:[#allocation7 + $0x38] sm:$0xff] %v75_v26 }
  0x2a   :  { %158 = shalt.err (!%p155_p0)
}
  0x2b   :  { %95 = dma.vmem_to_hbm [thread:$0]  %s90_s1, 1024, %s210_s2, [#allocation4], %s174_s12, %s174_s12, %s175_s13  }
  0x2c   :  { %171 = dma.done.wait [#allocation4], 1024  }
  0x2d   :  { %172 = vsyncadd [#allocation4], 4294966272 }
  0x2e   :  { %99 = vsyncpa [#allocation3], 1 }
  0x2f   :  { %100 = vsyncpa [#allocation6], 1 }
  0x30   :  { %101 = vsyncpa [#allocation4], 1 }

</bundles_post_ra>
